<compile_context>
chip_gen: v7x
topology: tpu7x:2x2x1
jax: 0.10.0
libtpu: 0.0.40
codegen_flags: <defaults>
</compile_context>

<pallas_src>
import jax
import jax.numpy as jnp
from jax.experimental import pallas as pl
from jax.experimental.pallas import tpu as pltpu


def _round_up(v, m):
    return ((v + m - 1) // m) * m


# --------------------------------------------------------------------------
# Fused per-stage kernel: bilinear upsample + skip add + BN + ReLU + 3x3 conv
# --------------------------------------------------------------------------
def _upsample_stage(x_p, skip_p, c):
    """x_p:    (N, Hin, in_cp)     activations, W/C packed on lanes (zero-padded)
       skip_p: (N, Hout, wp_cp)    skip, W-padded by 1 px + lane-padded, packed
       consts: wr (Hout, Hin), wck (in_cp, wp_cp), scale/shift (1, wp_cp),
               wconv (3, wp_cp, out_cp), bias_t (1, out_cp)
       returns (N, Hout, out_cp)."""
    n, hin, in_cp = x_p.shape
    hout, wout = c["hout"], c["wout"]
    wp_cp, out_cp = c["wp_cp"], c["out_cp"]

    def kernel(x_ref, skip_ref, wr_ref, wck_ref, sc_ref, sh_ref, wv_ref,
               b_ref, o_ref, a_ref):
        # Bilinear upsample (align_corners=False): W-interp FIRST (the kron
        # matmul is FLOP-dominant; run it over Hin rows, not Hout rows --
        # identical result by associativity), then the H-interp.
        t = jnp.dot(x_ref[0], wck_ref[...],
                    preferred_element_type=jnp.float32)          # (hin, wp_cp)
        up = jnp.dot(wr_ref[...], t,
                     preferred_element_type=jnp.float32)         # (hout, wp_cp)

        # Skip add + folded eval-mode BN (row-vector scale/shift, broadcast on
        # sublanes) + ReLU.  scale/shift are zero on the conv-halo / lane-pad
        # columns, so those columns stay exactly zero through affine + ReLU.
        a = jnp.maximum((up + skip_ref[0]) * sc_ref[...] + sh_ref[...], 0.0)

        # Stage `a` into a conv-padded VMEM scratch: interior rows at
        # [1:hout+1]; the two halo rows are re-zeroed every step (2 tiny row
        # stores) so correctness holds even if the batch axis is split across
        # TensorCores.
        zrow = jnp.zeros((1, wp_cp), jnp.float32)
        a_ref[0:1, :] = zrow
        a_ref[hout + 1:hout + 2, :] = zrow
        a_ref[1:hout + 1, :] = a

        # 3x3 SAME conv: kw taps + channel mixing folded into banded weights ->
        # three large-K matmuls (one per kh).  LHS loads are sublane-shifted
        # windows of the scratch ref (avoids whole-slab relayouts from
        # unaligned slices of a large value).
        y = jnp.dot(a_ref[0:hout, :], wv_ref[0],
                    preferred_element_type=jnp.float32)
        y = y + jnp.dot(a_ref[1:hout + 1, :], wv_ref[1],
                        preferred_element_type=jnp.float32)
        y = y + jnp.dot(a_ref[2:hout + 2, :], wv_ref[2],
                        preferred_element_type=jnp.float32)

        # Single lane-dense (multiple-of-128 lanes) full-block store.
        o_ref[0] = y + b_ref[...]

    return pl.pallas_call(
        kernel,
        out_shape=jax.ShapeDtypeStruct((n, hout, out_cp), jnp.float32),
        grid=(n,),
        in_specs=[
            pl.BlockSpec((1, hin, in_cp), lambda b: (b, 0, 0)),     # x (packed)
            pl.BlockSpec((1, hout, wp_cp), lambda b: (b, 0, 0)),    # skip (packed)
            pl.BlockSpec((hout, hin), lambda b: (0, 0)),            # H-interp
            pl.BlockSpec((in_cp, wp_cp), lambda b: (0, 0)),         # kron W-interp
            pl.BlockSpec((1, wp_cp), lambda b: (0, 0)),             # BN scale
            pl.BlockSpec((1, wp_cp), lambda b: (0, 0)),             # BN shift
            pl.BlockSpec((3, wp_cp, out_cp), lambda b: (0, 0, 0)),  # banded conv
            pl.BlockSpec((1, out_cp), lambda b: (0, 0)),            # bias
        ],
        out_specs=pl.BlockSpec((1, hout, out_cp), lambda b: (b, 0, 0)),
        scratch_shapes=[pltpu.VMEM((hout + 2, wp_cp), jnp.float32)],
        compiler_params=pltpu.CompilerParams(
            dimension_semantics=("parallel",),
            # >= default scoped VMEM on all chips; at production tiles this
            # should be computed from block bytes x buffer count.
            vmem_limit_bytes=32 * 1024 * 1024),
    )(x_p, skip_p, c["wr"], c["wck"], c["scale_vec"], c["shift_vec"],
      c["wconv"], c["bias_t"])


# --------------------------------------------------------------------------
# Wrapper-side weight / layout preparation (pure XLA, built ONCE per config)
# --------------------------------------------------------------------------
def _interp_matrix(out_size, in_size):
    """(out_size, in_size) row-stochastic matrix matching F.interpolate
    mode='bilinear', align_corners=False (separable, per axis)."""
    scale = in_size / out_size
    i = jnp.arange(out_size, dtype=jnp.float32)
    src = (i + 0.5) * scale - 0.5
    src = jnp.maximum(src, 0.0)                 # PyTorch clamps negative coords
    i0 = jnp.clip(jnp.floor(src).astype(jnp.int32), 0, in_size - 1)
    i1 = jnp.minimum(i0 + 1, in_size - 1)
    lam = src - i0.astype(jnp.float32)
    rows = jnp.arange(out_size)
    m = jnp.zeros((out_size, in_size), jnp.float32)
    m = m.at[rows, i0].add(1.0 - lam)
    m = m.at[rows, i1].add(lam)
    return m


def _banded_conv3x3_weights(w_oihw, wout):
    """(3, (wout+2)*cin, wout*cout): per-kh banded matmul weights for a 3x3
    SAME conv applied to activations packed as (H, W*Cin) with a 1-pixel
    zero halo.  Row index = wi*cin + ci, col index = wo*cout + co, value =
    w[co, ci, kh, wi - wo] when 0 <= wi - wo <= 2, else 0."""
    cout, cin, _, _ = w_oihw.shape
    wp = wout + 2
    w_k = jnp.transpose(w_oihw, (2, 3, 1, 0))                  # (kh, kw, ci, co)
    wi = jnp.arange(wp)[:, None]
    wo = jnp.arange(wout)[None, :]
    kw = wi - wo                                               # (wp, wout)
    valid = ((kw >= 0) & (kw <= 2)).astype(w_oihw.dtype)
    kw_c = jnp.clip(kw, 0, 2)
    wk = w_k[:, kw_c, :, :] * valid[None, :, :, None, None]    # (3,wp,wout,ci,co)
    wk = jnp.transpose(wk, (0, 1, 3, 2, 4))                    # (3,wp,ci,wout,co)
    return wk.reshape(3, wp * cin, wout * cout)


def init_params(key, num_features, up_sizes):
    """Deterministic synthetic parameters for each _Upsample.blend_conv block."""
    params = []
    cin = num_features
    eps = 1e-5
    for cout in up_sizes:
        key, k0, k1, k2, k3, k4, k5 = jax.random.split(key, 7)
        gamma = jax.random.uniform(k0, (cin,), jnp.float32, 0.5, 1.5)
        beta = 0.1 * jax.random.normal(k1, (cin,), jnp.float32)
        rmean = 0.1 * jax.random.normal(k2, (cin,), jnp.float32)
        rvar = jax.random.uniform(k3, (cin,), jnp.float32, 0.5, 1.5)
        w_oihw = jax.random.normal(k4, (cout, cin, 3, 3), jnp.float32) / jnp.sqrt(9.0 * cin)
        bias = 0.01 * jax.random.normal(k5, (cout,), jnp.float32)
        scale = gamma / jnp.sqrt(rvar + eps)            # eval-mode BN folded
        shift = beta - rmean * scale
        params.append(dict(scale=scale, shift=shift, w_oihw=w_oihw, bias=bias))
        cin = cout
    return params


def prepare_stage_constants(params, x_shape, skip_shapes):
    """Build per-stage packed weights / constants once (shape & param only) so
    the kron / banded-conv expansion is NOT rebuilt every forward call."""
    n, cin, hin, win = x_shape
    in_cp = _round_up(win * cin, 128)
    consts = []
    for p, s_shape in zip(params, reversed(list(skip_shapes))):
        _, cs, hout, wout = s_shape
        assert cs == cin, (cs, cin)
        cout = p["bias"].shape[0]
        wp_c = (wout + 2) * cin                       # true packed padded width
        wp_cp = _round_up(wp_c, 128)                  # lane-padded
        out_c = wout * cout
        out_cp = _round_up(out_c, 128)

        # Interpolation matrices (no H halo rows; conv H padding lives in the
        # kernel's VMEM scratch).
        wr = _interp_matrix(hout, hin)                                  # (hout, hin)
        wc = _interp_matrix(wout, win)                                  # (wout, win)
        wck = jnp.kron(wc, jnp.eye(cin, dtype=jnp.float32)).T           # (win*cin, wout*cin)
        wck_full = jnp.zeros((in_cp, wp_cp), jnp.float32)
        wck_full = wck_full.at[:win * cin, cin:(wout + 1) * cin].set(wck)

        # Folded eval-BN scale/shift as (1, wp_cp) row vectors, zero on the
        # conv-halo and lane-pad columns (keeps those columns exactly zero).
        scale_vec = jnp.zeros((1, wp_cp), jnp.float32)
        scale_vec = scale_vec.at[0, cin:(wout + 1) * cin].set(jnp.tile(p["scale"], wout))
        shift_vec = jnp.zeros((1, wp_cp), jnp.float32)
        shift_vec = shift_vec.at[0, cin:(wout + 1) * cin].set(jnp.tile(p["shift"], wout))

        banded = _banded_conv3x3_weights(p["w_oihw"], wout)             # (3, wp_c, out_c)
        wconv = jnp.zeros((3, wp_cp, out_cp), jnp.float32)
        wconv = wconv.at[:, :wp_c, :out_c].set(banded)
        bias_t = jnp.zeros((1, out_cp), jnp.float32)
        bias_t = bias_t.at[0, :out_c].set(jnp.tile(p["bias"], wout))

        consts.append(dict(
            hin=hin, win=win, cin=cin, hout=hout, wout=wout, cout=cout,
            in_cp=in_cp, wp_cp=wp_cp, out_cp=out_cp,
            wr=wr, wck=wck_full, scale_vec=scale_vec, shift_vec=shift_vec,
            wconv=wconv, bias_t=bias_t))
        hin, win, cin, in_cp = hout, wout, cout, out_cp
    return consts


def upsample_forward(stage_consts, x_nchw, skip_layers_nchw):
    """Pallas implementation of Upsample.forward (use_aux=False)."""
    x = jnp.transpose(x_nchw, (0, 2, 3, 1)).astype(jnp.float32)   # NCHW -> NHWC
    n, hin, win, cin = x.shape
    in_c = win * cin
    x_p = jnp.pad(x.reshape(n, hin, in_c),
                  ((0, 0), (0, 0), (0, stage_consts[0]["in_cp"] - in_c)))
    aux = []
    for c, skip_nchw in zip(stage_consts, reversed(skip_layers_nchw)):
        skip = jnp.transpose(skip_nchw, (0, 2, 3, 1)).astype(jnp.float32)
        hout, wout, cin_s = c["hout"], c["wout"], c["cin"]
        wp_c = (wout + 2) * cin_s
        # Skip, W-padded by 1 px (conv halo) and lane-padded, in packed layout.
        skip_p = jnp.pad(skip, ((0, 0), (0, 0), (1, 1), (0, 0))
                         ).reshape(n, hout, wp_c)
        skip_p = jnp.pad(skip_p, ((0, 0), (0, 0), (0, c["wp_cp"] - wp_c)))

        x_p = _upsample_stage(x_p, skip_p, c)
        aux.append(None)                                          # use_aux=False

    last = stage_consts[-1]
    out_c = last["wout"] * last["cout"]
    out = x_p[:, :, :out_c].reshape(n, last["hout"], last["wout"], last["cout"])
    return jnp.transpose(out, (0, 3, 1, 2)), aux                  # back to NCHW


# --------------------------------------------------------------------------
# Pure-JAX reference (NCHW) for a correctness check (no torch needed)
# --------------------------------------------------------------------------
def reference_forward(params, x, skip_layers):
    hi = jax.lax.Precision.HIGHEST
    for i, skip in enumerate(reversed(skip_layers)):
        wr = _interp_matrix(skip.shape[2], x.shape[2])
        wc = _interp_matrix(skip.shape[3], x.shape[3])
        xi = jnp.einsum("oh,nchw->ncow", wr, x, precision=hi)
        xi = jnp.einsum("pw,ncow->ncop", wc, xi, precision=hi)
        x = xi + skip
        p = params[i]
        a = jnp.maximum(x * p["scale"].reshape(1, -1, 1, 1)
                        + p["shift"].reshape(1, -1, 1, 1), 0.0)
        w_hwio = jnp.transpose(p["w_oihw"], (2, 3, 1, 0))
        y = jax.lax.conv_general_dilated(
            a, w_hwio, (1, 1), "SAME",
            dimension_numbers=("NCHW", "HWIO", "NCHW"), precision=hi)
        x = y + p["bias"].reshape(1, -1, 1, 1)
    return x


if __name__ == "__main__":
    key = jax.random.PRNGKey(0)
    k1, k2, k3, kp = jax.random.split(key, 4)

    num_features = 16
    up_sizes = [16, 8]          # Upsample(num_features=16, up_sizes=[16, 8], ...)
    num_classes = 5             # unused (use_aux=False)

    # NCHW inputs (PyTorch convention). skip_layers iterated in reverse order,
    # so channel counts of reversed skips are [num_features, up_sizes[0]] = [16, 16].
    x = jax.random.normal(k1, (2, 16, 4, 4), jnp.float32)
    skip_big = jax.random.normal(k2, (2, 16, 16, 16), jnp.float32)
    skip_small = jax.random.normal(k3, (2, 16, 8, 8), jnp.float32)
    skip_layers = [skip_big, skip_small]

    params = init_params(kp, num_features, up_sizes)

    # Weight/layout constants built once and reused across forward calls.
    stage_consts = prepare_stage_constants(params, x.shape,
                                           [s.shape for s in skip_layers])

    out, aux = upsample_forward(stage_consts, x, skip_layers)
    out = jax.block_until_ready(out)
    assert out.shape == (2, up_sizes[-1], 16, 16), out.shape
    assert all(a is None for a in aux)

    ref = jax.block_until_ready(reference_forward(params, x, skip_layers))
    err = float(jnp.max(jnp.abs(out - ref)))
    assert jnp.allclose(out, ref, atol=2e-3, rtol=2e-3), err

    print("KERNEL_OK")
</pallas_src>

<mosaic_0001>
module attributes {stable_mosaic.version = 11 : i64} {
  func.func @kernel(%arg0: i32, %arg1: memref<1x4x128xf32, #tpu.memory_space<vmem>>, %arg2: memref<1x8x256xf32, #tpu.memory_space<vmem>>, %arg3: memref<8x4xf32, #tpu.memory_space<vmem>>, %arg4: memref<128x256xf32, #tpu.memory_space<vmem>>, %arg5: memref<1x256xf32, #tpu.memory_space<vmem>>, %arg6: memref<1x256xf32, #tpu.memory_space<vmem>>, %arg7: memref<3x256x128xf32, #tpu.memory_space<vmem>>, %arg8: memref<1x128xf32, #tpu.memory_space<vmem>>, %arg9: memref<1x8x128xf32, #tpu.memory_space<vmem>>, %arg10: memref<10x256xf32, #tpu.memory_space<vmem>>) attributes {dimension_semantics = [#tpu.dimension_semantics<parallel>], iteration_bounds = array<i64: 2>, scalar_prefetch = 0 : i64, scratch_operands = 1 : i64, tpu.core_type = #tpu.core_type<tc>, window_params = [{transform_indices = @transform_0, window_bounds = array<i64: 1, 4, 128>}, {transform_indices = @transform_1, window_bounds = array<i64: 1, 8, 256>}, {pipeline_mode = #tpu.pipeline_mode<synchronous>, transform_indices = @transform_2, window_bounds = array<i64: 8, 4>}, {pipeline_mode = #tpu.pipeline_mode<synchronous>, transform_indices = @transform_3, window_bounds = array<i64: 128, 256>}, {pipeline_mode = #tpu.pipeline_mode<synchronous>, transform_indices = @transform_4, window_bounds = array<i64: 1, 256>}, {pipeline_mode = #tpu.pipeline_mode<synchronous>, transform_indices = @transform_5, window_bounds = array<i64: 1, 256>}, {pipeline_mode = #tpu.pipeline_mode<synchronous>, transform_indices = @transform_6, window_bounds = array<i64: 3, 256, 128>}, {pipeline_mode = #tpu.pipeline_mode<synchronous>, transform_indices = @transform_7, window_bounds = array<i64: 1, 128>}, {transform_indices = @transform_8, window_bounds = array<i64: 1, 8, 128>}]} {
    %c0 = arith.constant 0 : index
    %c0_0 = arith.constant 0 : index
    %c0_1 = arith.constant 0 : index
    %0 = vector.load %arg1[%c0, %c0_0, %c0_1] : memref<1x4x128xf32, #tpu.memory_space<vmem>>, vector<1x4x128xf32>
    %1 = vector.shape_cast %0 : vector<1x4x128xf32> to vector<4x128xf32>
    %c0_2 = arith.constant 0 : index
    %c0_3 = arith.constant 0 : index
    %2 = vector.load %arg4[%c0_2, %c0_3] : memref<128x256xf32, #tpu.memory_space<vmem>>, vector<128x256xf32>
    %cst = arith.constant dense<0.000000e+00> : vector<4x256xf32>
    %3 = tpu.matmul %1, %2, %cst {dimension_numbers = #tpu.dot_dimension_numbers<[1], [0], [0], [1], [0, 0, 1, 1], [], []>} : vector<4x128xf32>, vector<128x256xf32>, vector<4x256xf32> -> vector<4x256xf32>
    %c0_4 = arith.constant 0 : index
    %c0_5 = arith.constant 0 : index
    %4 = vector.load %arg3[%c0_4, %c0_5] : memref<8x4xf32, #tpu.memory_space<vmem>>, vector<8x4xf32>
    %cst_6 = arith.constant dense<0.000000e+00> : vector<8x256xf32>
    %5 = tpu.matmul %4, %3, %cst_6 {dimension_numbers = #tpu.dot_dimension_numbers<[1], [0], [0], [1], [0, 0, 1, 1], [], []>} : vector<8x4xf32>, vector<4x256xf32>, vector<8x256xf32> -> vector<8x256xf32>
    %c0_7 = arith.constant 0 : index
    %c0_8 = arith.constant 0 : index
    %c0_9 = arith.constant 0 : index
    %6 = vector.load %arg2[%c0_7, %c0_8, %c0_9] : memref<1x8x256xf32, #tpu.memory_space<vmem>>, vector<1x8x256xf32>
    %7 = vector.shape_cast %6 : vector<1x8x256xf32> to vector<8x256xf32>
    %8 = arith.addf %5, %7 : vector<8x256xf32>
    %c0_10 = arith.constant 0 : index
    %c0_11 = arith.constant 0 : index
    %9 = vector.load %arg5[%c0_10, %c0_11] : memref<1x256xf32, #tpu.memory_space<vmem>>, vector<1x256xf32>
    %10 = vector.broadcast %9 : vector<1x256xf32> to vector<8x256xf32>
    %11 = arith.mulf %8, %10 : vector<8x256xf32>
    %c0_12 = arith.constant 0 : index
    %c0_13 = arith.constant 0 : index
    %12 = vector.load %arg6[%c0_12, %c0_13] : memref<1x256xf32, #tpu.memory_space<vmem>>, vector<1x256xf32>
    %13 = vector.broadcast %12 : vector<1x256xf32> to vector<8x256xf32>
    %14 = arith.addf %11, %13 : vector<8x256xf32>
    %cst_14 = arith.constant 0.000000e+00 : f32
    %15 = vector.broadcast %cst_14 : f32 to vector<8x256xf32>
    %16 = arith.maximumf %14, %15 : vector<8x256xf32>
    %cst_15 = arith.constant 0.000000e+00 : f32
    %17 = vector.broadcast %cst_15 : f32 to vector<1x256xf32>
    %c0_16 = arith.constant 0 : index
    %c0_17 = arith.constant 0 : index
    %18 = vector.load %arg10[%c0_16, %c0_17] : memref<10x256xf32, #tpu.memory_space<vmem>>, vector<1x256xf32>
    tpu.vector_store %arg10[%c0_16, %c0_17], %17 {strides = array<i32>} : memref<10x256xf32, #tpu.memory_space<vmem>>, vector<1x256xf32>,
    %c9 = arith.constant 9 : index
    %c0_18 = arith.constant 0 : index
    %19 = vector.load %arg10[%c9, %c0_18] : memref<10x256xf32, #tpu.memory_space<vmem>>, vector<1x256xf32>
    tpu.vector_store %arg10[%c9, %c0_18], %17 {strides = array<i32>} : memref<10x256xf32, #tpu.memory_space<vmem>>, vector<1x256xf32>,
    %c1 = arith.constant 1 : index
    %c0_19 = arith.constant 0 : index
    %20 = vector.load %arg10[%c1, %c0_19] : memref<10x256xf32, #tpu.memory_space<vmem>>, vector<8x256xf32>
    tpu.vector_store %arg10[%c1, %c0_19], %16 {strides = array<i32>} : memref<10x256xf32, #tpu.memory_space<vmem>>, vector<8x256xf32>,
    %c0_20 = arith.constant 0 : index
    %c0_21 = arith.constant 0 : index
    %21 = vector.load %arg10[%c0_20, %c0_21] : memref<10x256xf32, #tpu.memory_space<vmem>>, vector<8x256xf32>
    %c0_22 = arith.constant 0 : index
    %c0_23 = arith.constant 0 : index
    %c0_24 = arith.constant 0 : index
    %22 = vector.load %arg7[%c0_22, %c0_23, %c0_24] : memref<3x256x128xf32, #tpu.memory_space<vmem>>, vector<1x256x128xf32>
    %23 = vector.shape_cast %22 : vector<1x256x128xf32> to vector<256x128xf32>
    %cst_25 = arith.constant dense<0.000000e+00> : vector<8x128xf32>
    %24 = tpu.matmul %21, %23, %cst_25 {dimension_numbers = #tpu.dot_dimension_numbers<[1], [0], [0], [1], [0, 0, 1, 1], [], []>} : vector<8x256xf32>, vector<256x128xf32>, vector<8x128xf32> -> vector<8x128xf32>
    %c1_26 = arith.constant 1 : index
    %c0_27 = arith.constant 0 : index
    %25 = vector.load %arg10[%c1_26, %c0_27] : memref<10x256xf32, #tpu.memory_space<vmem>>, vector<8x256xf32>
    %c1_28 = arith.constant 1 : index
    %c0_29 = arith.constant 0 : index
    %c0_30 = arith.constant 0 : index
    %26 = vector.load %arg7[%c1_28, %c0_29, %c0_30] : memref<3x256x128xf32, #tpu.memory_space<vmem>>, vector<1x256x128xf32>
    %27 = vector.shape_cast %26 : vector<1x256x128xf32> to vector<256x128xf32>
    %cst_31 = arith.constant dense<0.000000e+00> : vector<8x128xf32>
    %28 = tpu.matmul %25, %27, %cst_31 {dimension_numbers = #tpu.dot_dimension_numbers<[1], [0], [0], [1], [0, 0, 1, 1], [], []>} : vector<8x256xf32>, vector<256x128xf32>, vector<8x128xf32> -> vector<8x128xf32>
    %29 = arith.addf %24, %28 : vector<8x128xf32>
    %c2 = arith.constant 2 : index
    %c0_32 = arith.constant 0 : index
    %30 = vector.load %arg10[%c2, %c0_32] : memref<10x256xf32, #tpu.memory_space<vmem>>, vector<8x256xf32>
    %c2_33 = arith.constant 2 : index
    %c0_34 = arith.constant 0 : index
    %c0_35 = arith.constant 0 : index
    %31 = vector.load %arg7[%c2_33, %c0_34, %c0_35] : memref<3x256x128xf32, #tpu.memory_space<vmem>>, vector<1x256x128xf32>
    %32 = vector.shape_cast %31 : vector<1x256x128xf32> to vector<256x128xf32>
    %cst_36 = arith.constant dense<0.000000e+00> : vector<8x128xf32>
    %33 = tpu.matmul %30, %32, %cst_36 {dimension_numbers = #tpu.dot_dimension_numbers<[1], [0], [0], [1], [0, 0, 1, 1], [], []>} : vector<8x256xf32>, vector<256x128xf32>, vector<8x128xf32> -> vector<8x128xf32>
    %34 = arith.addf %29, %33 : vector<8x128xf32>
    %c0_37 = arith.constant 0 : index
    %c0_38 = arith.constant 0 : index
    %35 = vector.load %arg8[%c0_37, %c0_38] : memref<1x128xf32, #tpu.memory_space<vmem>>, vector<1x128xf32>
    %36 = vector.broadcast %35 : vector<1x128xf32> to vector<8x128xf32>
    %37 = arith.addf %34, %36 : vector<8x128xf32>
    %c0_39 = arith.constant 0 : index
    %c0_40 = arith.constant 0 : index
    %c0_41 = arith.constant 0 : index
    %38 = vector.load %arg9[%c0_39, %c0_40, %c0_41] : memref<1x8x128xf32, #tpu.memory_space<vmem>>, vector<1x8x128xf32>
    %39 = vector.shape_cast %38 : vector<1x8x128xf32> to vector<8x128xf32>
    %40 = vector.shape_cast %37 : vector<8x128xf32> to vector<1x8x128xf32>
    tpu.vector_store %arg9[%c0_39, %c0_40, %c0_41], %40 {strides = array<i32>} : memref<1x8x128xf32, #tpu.memory_space<vmem>>, vector<1x8x128xf32>,
    return
  }
  func.func @transform_0(%arg0: i32) -> (i32, i32, i32) {
    %c0_i32 = arith.constant 0 : i32
    %c0_i32_0 = arith.constant 0 : i32
    %c0_i32_1 = arith.constant 0 : i32
    return %arg0, %c0_i32, %c0_i32_0 : i32, i32, i32
  }
  func.func @transform_1(%arg0: i32) -> (i32, i32, i32) {
    %c0_i32 = arith.constant 0 : i32
    %c0_i32_0 = arith.constant 0 : i32
    %c0_i32_1 = arith.constant 0 : i32
    return %arg0, %c0_i32, %c0_i32_0 : i32, i32, i32
  }
  func.func @transform_2(%arg0: i32) -> (i32, i32) {
    %c0_i32 = arith.constant 0 : i32
    %c0_i32_0 = arith.constant 0 : i32
    %c0_i32_1 = arith.constant 0 : i32
    return %c0_i32, %c0_i32_0 : i32, i32
  }
  func.func @transform_3(%arg0: i32) -> (i32, i32) {
    %c0_i32 = arith.constant 0 : i32
    %c0_i32_0 = arith.constant 0 : i32
    %c0_i32_1 = arith.constant 0 : i32
    return %c0_i32, %c0_i32_0 : i32, i32
  }
  func.func @transform_4(%arg0: i32) -> (i32, i32) {
    %c0_i32 = arith.constant 0 : i32
    %c0_i32_0 = arith.constant 0 : i32
    %c0_i32_1 = arith.constant 0 : i32
    return %c0_i32, %c0_i32_0 : i32, i32
  }
  func.func @transform_5(%arg0: i32) -> (i32, i32) {
    %c0_i32 = arith.constant 0 : i32
    %c0_i32_0 = arith.constant 0 : i32
    %c0_i32_1 = arith.constant 0 : i32
    return %c0_i32, %c0_i32_0 : i32, i32
  }
  func.func @transform_6(%arg0: i32) -> (i32, i32, i32) {
    %c0_i32 = arith.constant 0 : i32
    %c0_i32_0 = arith.constant 0 : i32
    %c0_i32_1 = arith.constant 0 : i32
    %c0_i32_2 = arith.constant 0 : i32
    return %c0_i32, %c0_i32_0, %c0_i32_1 : i32, i32, i32
  }
  func.func @transform_7(%arg0: i32) -> (i32, i32) {
    %c0_i32 = arith.constant 0 : i32
    %c0_i32_0 = arith.constant 0 : i32
    %c0_i32_1 = arith.constant 0 : i32
    return %c0_i32, %c0_i32_0 : i32, i32
  }
  func.func @transform_8(%arg0: i32) -> (i32, i32, i32) {
    %c0_i32 = arith.constant 0 : i32
    %c0_i32_0 = arith.constant 0 : i32
    %c0_i32_1 = arith.constant 0 : i32
    return %arg0, %c0_i32, %c0_i32_0 : i32, i32, i32
  }
}

</mosaic_0001>

<bundles_post_ra>
// kernel: tpu_custom_call.1
= control target key start
LH: loop header
LB: loop body
LE: loop exit
PB: predicated region body
PF: predicated region fallthrough
CT: control target
= control target key end

     0   :  { %13 = vsyncpa [#allocation4], 0  ;;  %s1872_s0 = inlined_call_operand.vmem [shape: f32[2,4,128], index: 0, kind: input, shape index: {}]   ;;  %s1873_s1 = inlined_call_operand.hbm [shape: f32[2,8,256], index: 1, kind: input, shape index: {}]   ;;  %s1874_s2 = inlined_call_operand.vmem [shape: f32[8,4], index: 2, kind: input, shape index: {}]   ;;  %s1875_s3 = inlined_call_operand.hbm [shape: f32[128,256], index: 3, kind: input, shape index: {}]   ;;  %s1876_s4 = inlined_call_operand.vmem [shape: f32[1,256], index: 4, kind: input, shape index: {}]   ;;  %s1877_s5 = inlined_call_operand.vmem [shape: f32[1,256], index: 5, kind: input, shape index: {}]   ;;  %s1878_s6 = inlined_call_operand.hbm [shape: f32[3,256,128], index: 6, kind: input, shape index: {}]   ;;  %s1879_s7 = inlined_call_operand.vmem [shape: f32[1,128], index: 7, kind: input, shape index: {}]   ;;  %s1880_s8 = inlined_call_operand.hbm [shape: f32[2,8,128], index: 8, kind: output, shape index: {}]  }
   0x1   :  { %15 = vsyncpa [#allocation4 + $0x1], 0 }
   0x2   :  { %16 = vsyncpa [#allocation7], 0 }
   0x3   :  { %17 = vsyncpa [#allocation5], 0 }
   0x4   :  { %19 = vsyncpa [#allocation5 + $0x1], 0  ;;  %s1615_s27 = smov 0   ;;  %s1617_s28 = smov 0  }
   0x5   :  { %s1619_s29 = smov 0   ;;  %s1621_s30 = smov 0  }
   0x6 LB: > { %s1636_s9 = sadd.s32 4294967295, %s1559_s30   ;;  %s1075_s10 = sadd.s32 4294967294, %s1559_s30   ;;  %s1559_s30 = sphi %s1621_s30, %s1900_s30   ;;  %s1555_s29 = sphi %s1619_s29, %s1899_s29   ;;  %s1551_s28 = sphi %s1617_s28, %s1898_s28   ;;  %s1547_s27 = sphi %s1615_s27, %s1897_s27  }
   0x7   : > { %p71_p0 = scmp.ne.s32.totalorder %s1551_s28, %s1547_s27  ;;  %p1881_p1 = scmp.eq.s32.totalorder %s1636_s9, 0 }
   0x8   : > { %p227_p3 = scmp.eq.s32.totalorder %s1075_s10, 1  ;;  %p1076_p5 = scmp.ge.s32.totalorder %s1559_s30, 1 }
   0x9   : > { %p1645_p4 = por %p1881_p1, %p71_p0  ;;  %p234_p7 = scmp.lt.s32.totalorder %s1559_s30, 3 }
   0xa   : > { %p1650_p6 = por %p227_p3, %p71_p0  ;;  %s1561_s14 = smov [#allocation6]  }
   0xb   : > { %s1884_s11 = scalar_select %p1645_p4, 1, 0 }
   0xc   : > { %s1885_s12 = scalar_select %p1650_p6, 1, 0 }
   0xd   : > { %p1655_p8 = pnand %p1076_p5, %p234_p7  ;;  %s249_s15 = sshll.u32 %s1561_s14, 4  ;;  %s1659_s15 = int_to_ptr.vmem [resolvable:$true] %s249_s15 }
   0xe   : > { %s1562_s17 = smov [#allocation8]   ;;  %s1403_s21 = scalar_lea.hbm %s1875_s3, 4096 }
   0xf   : > { %p1343_p9 = pneg %p1655_p8  ;;  %s268_s18 = sshll.u32 %s1562_s17, 4  ;;  %s1670_s18 = int_to_ptr.vmem [resolvable:$true] %s268_s18 }
  0x10   : > { %p1404_p12 = scmp.ne.s32.totalorder %s1875_s3, %s1403_s21  ;;  %p1410_p5 = scmp.lt.u32.totalorder %s1403_s21, %s1875_s3 }
  0x11   : > { %p1666_p11 = pnand %p1343_p9, %p1881_p1 }
  0x13   : > { %p1405_p13 = pneg %p1666_p11 }
  0x15   : > { %p1406_p0 = pnand %p1405_p13, %p1404_p12 }
  0x17   : > { %p1407_p3 = pneg %p1406_p0 }
  0x19   : > { %p1412_p7 = pnand %p1410_p5, %p1407_p3 }
  0x1b   : > { %1415 = shalt.err (!%p1412_p7)
}
  0x1c   : > { %s1416_s26 = scalar_lea.vmem %s1659_s15, 4096  ;;  %p1424_p2 = scmp.lt.s32.totalorder %s1659_s15, %s1659_s15 }
  0x1d   : > { %p1417_p9 = scmp.ne.s32.totalorder %s1659_s15, %s1416_s26  ;;  %p1425_p12 = scmp.lt.s32.totalorder %s1416_s26, %s1416_s26 }
  0x1f   : > { %p1419_p10 = pnand %p1417_p9, %p1405_p13  ;;  %p1426_p0 = por %p1425_p12, %p1424_p2 }
  0x21   : > { %p1420_p1 = pneg %p1419_p10 }
  0x23   : > { %p1427_p6 = pnand %p1426_p0, %p1420_p1 }
  0x25   : > { %1430 = shalt.err (!%p1427_p6)
}
  0x26   : > { %s1563_s10 = smov 256   ;;  %s1564_s14 = smov 16  }
  0x27   : > { %1346 = dma.hbm_to_vmem [thread:$0]  (!%p1666_p11), %s1875_s3, 4096, %s1659_s15, [#allocation7], %s1563_s10, %s1563_s10, %s1564_s14  }
  0x28   : > { %s1431_s22 = scalar_lea.hbm %s1878_s6, 12288 }
  0x29   : > { %p1432_p2 = scmp.ne.s32.totalorder %s1878_s6, %s1431_s22  ;;  %p1438_p10 = scmp.lt.u32.totalorder %s1431_s22, %s1878_s6 }
  0x2b   : > { %p1434_p1 = pnand %p1432_p2, %p1405_p13 }
  0x2d   : > { %p1435_p6 = pneg %p1434_p1 }
  0x2f   : > { %p1440_p3 = pnand %p1438_p10, %p1435_p6 }
  0x31   : > { %1443 = shalt.err (!%p1440_p3)
}
  0x32   : > { %s1444_s15 = scalar_lea.vmem %s1670_s18, 12288  ;;  %p1452_p12 = scmp.lt.s32.totalorder %s1670_s18, %s1670_s18 }
  0x33   : > { %p1445_p5 = scmp.ne.s32.totalorder %s1670_s18, %s1444_s15  ;;  %p1453_p0 = scmp.lt.s32.totalorder %s1444_s15, %s1444_s15 }
  0x35   : > { %p1447_p7 = pnand %p1445_p5, %p1405_p13  ;;  %p1454_p2 = por %p1453_p0, %p1452_p12 }
  0x37   : > { %p1448_p9 = pneg %p1447_p7 }
  0x39   : > { %p1455_p1 = pnand %p1454_p2, %p1448_p9 }
  0x3b   : > { %1458 = shalt.err (!%p1455_p1)
}
  0x3c   : > { %s1565_s10 = smov 128   ;;  %s1566_s14 = smov 8  }
  0x3d   : > { %1349 = dma.hbm_to_vmem [thread:$0]  (!%p1666_p11), %s1878_s6, 12288, %s1670_s18, [#allocation7], %s1565_s10, %s1565_s10, %s1566_s14  }
  0x3e   : > { %s1725_s20 = sadd.s32 1, %s1559_s30   ;;  %s58_s22 = sadd.s32 1, %s1555_s29 }
  0x3f   : > { %s55_s21 = ssub.s32 %s1559_s30, %s1725_s20  ;;  %p65_p6 = scmp.ne.s32.totalorder %s1555_s29, %s1551_s28 }
  0x40   : > { %p56_p13 = scmp.eq.s32.totalorder %s55_s21, 0  ;;  %p66_p10 = scmp.eq.s32.totalorder %s1559_s30, 0 }
  0x41   : > { %p1888_p5 = scmp.eq.s32.totalorder %s1636_s9, 1  ;;  %p1360_p9 = scmp.lt.s32.totalorder %s1559_s30, 2 }
  0x42   : > { %s1734_s23 = scalar_select %p56_p13, %s1555_s29, %s58_s22  }
  0x43   : > { %p67_p3 = por %p66_p10, %p65_p6  ;;  %p1738_p7 = por %p1888_p5, %p65_p6 }
  0x44   : > { %s292_s16 = sand.u32 1, %s1555_s29   ;;  %s1097_s18 = sshll.u32 %s1559_s30, 8 }
  0x45   : > { %s1889_s24 = scalar_select %p1738_p7, 1, 0 }
  0x46   : > { %s1080_s25 = sshll.u32 %s292_s16, 4  ;;  %s1748_s10 = scalar_lea.hbm %s1873_s1, %s1097_s18 }
  0x47   : > { %s296_s14 = scalar_lea.vmem [#allocation3], %s1080_s25  ;;  %p1752_p11 = pnand %p1360_p9, %p67_p3 }
  0x48   : > { %s304_s17 = sshll.u32 %s296_s14, 4  ;;  %s293_s21 = scalar_lea.sflag [#allocation4], %s292_s16  ;;  %s1750_s17 = int_to_ptr.vmem [resolvable:$true] %s304_s17 }
  0x49   : > { %s1459_s22 = scalar_lea.hbm %s1748_s10, 256  ;;  %p1461_p0 = pneg %p1752_p11 }
  0x4a   : > { %p1460_p12 = scmp.ne.s32.totalorder %s1748_s10, %s1459_s22  ;;  %s1464_s26 = scalar_lea.hbm %s1873_s1, 512 }
  0x4b   : > { %p1465_p13 = scmp.lt.u32.totalorder %s1748_s10, %s1873_s1  ;;  %p1466_p6 = scmp.lt.u32.totalorder %s1464_s26, %s1459_s22 }
  0x4c   : > { %p1462_p2 = pnand %p1461_p0, %p1460_p12  ;;  %p1468_p3 = scmp.lt.u32.totalorder %s1459_s22, %s1748_s10 }
  0x4d   : > { %p1467_p10 = por %p1466_p6, %p1465_p13 }
  0x4e   : > { %p1463_p1 = pneg %p1462_p2 }
  0x4f   : > { %p1469_p5 = por %p1468_p3, %p1467_p10 }
  0x51   : > { %p1470_p9 = pnand %p1469_p5, %p1463_p1 }
  0x53   : > { %1473 = shalt.err (!%p1470_p9)
}
  0x54   : > { %s1474_s16 = scalar_lea.vmem %s1750_s17, 256  ;;  %s1567_s18 = smov [#allocation3]  }
  0x55   : > { %p1475_p12 = scmp.ne.s32.totalorder %s1750_s17, %s1474_s16  ;;  %s1479_s25 = sshll.u32 %s1567_s18, 4  ;;  %s1480_s25 = int_to_ptr.vmem [resolvable:$false] %s1479_s25 }
  0x56   : > { %s1481_s15 = scalar_lea.vmem %s1480_s25, 512  ;;  %p1482_p4 = scmp.lt.s32.totalorder %s1750_s17, %s1480_s25 }
  0x57   : > { %p1477_p2 = pnand %p1475_p12, %p1461_p0  ;;  %p1483_p13 = scmp.lt.s32.totalorder %s1481_s15, %s1474_s16 }
  0x59   : > { %p1478_p7 = pneg %p1477_p2  ;;  %p1484_p6 = por %p1483_p13, %p1482_p4 }
  0x5b   : > { %p1485_p10 = pnand %p1484_p6, %p1478_p7 }
  0x5d   : > { %1488 = shalt.err (!%p1485_p10)
}
  0x5e   : > { %1353 = dma.hbm_to_vmem [thread:$0]  (!%p1752_p11), %s1748_s10, 256, %s1750_s17, %s293_s21  }
  0x5f   : > { %313 = sbr.rel (%p1655_p8) target bundleno = 857 (0x359), region = 52  ;;  %s1784_s22 = sand.u32 (!%p1655_p8), 1, %s1551_s28  }
  0x60   : > { %s1084_s26 = sshll.u32 (!%p1655_p8), %s1784_s22, 4  ;;  %s316_s14 = scalar_lea.sflag (!%p1655_p8), [#allocation4], %s1784_s22 }
  0x61   : > { %s1788_s16 = scalar_lea.vmem (!%p1655_p8), [#allocation3], %s1084_s26  ;;  %p1891_p4 = scmp.ne.s32.totalorder (!%p1655_p8), %s1884_s11, 0 }
  0x66   : > { %1534 = dma.done.wait (%p1891_p4), %s316_s14, 256  }
  0x67   : > { %1536 = vsyncadd (%p1891_p4), %s316_s14, 4294967040  ;;  %p1892_p7 = scmp.eq.s32.totalorder %s1636_s9, 0 }
  0x69   : > { %1538 = dma.done.wait (%p1892_p7), [#allocation7], 16384   ;;  %p1893_p8 = pmov %p1892_p7 }
  0x6a   : > { %v559_v0 = vlaneseq  ;;  %v1568_v1 = vmov 0.0   ;;  %v370_v2 = vld [vmem:[#allocation6 + $0x8] sm:$0xff]  ;;  %v372_v3 = vld [vmem:[#allocation6 + $0x18] sm:$0xff]  ;;  %v369_v4 = vld [vmem:[#allocation6] sm:$0xff]  ;;  %p364_p11 = scmp.lt.s32.totalorder %s1636_s9, 1  ;;  %vm479_vm1 = vcmask 1043456  }
  0x6b   : > { %1540 = vsyncadd (%p1893_p8), [#allocation7], 4294950912  ;;  %465 = vmatprep.mubr.f32.mxu0 %v1568_v1  ;;  %550 = vmatprep.mubr.f32.mxu1 %v1568_v1  ;;  %v1203_v5 = vpack.c.bf16 %v372_v3, %v370_v2  ;;  %v371_v6 = vld [vmem:[#allocation6 + $0x10] sm:$0xff]  ;;  %v374_v7 = vld [vmem:[#allocation6 + $0x28] sm:$0xff]  ;;  %vm475_vm2 = vcmask 31744   ;;  %vm681_vm3 = vcmask 1046528  }
  0x6c   : > { %vm589_vm0 = vcmp.lt.s32.totalorder %v559_v0, 256  ;;  %v376_v8 = vld [vmem:[#allocation6 + $0x38] sm:$0xff]  ;;  %v1205_v9 = vpack.c.bf16 %v371_v6, %v369_v4  ;;  %v373_v11 = vld [vmem:[#allocation6 + $0x20] sm:$0xff]  ;;  %v375_v12 = vld [vmem:[#allocation6 + $0x30] sm:$0xff]  ;;  %s365_s11 = scalar_select %p364_p11, %s1636_s9, 1  ;;  %vm871_vm4 = vcmask 1045504  }
  0x6d   : > { %591 = vst.msk [vmem:[#allocation2] ss:$8 sm:$0x3] %vm589_vm0, %v1568_v1  ;;  %594 = vst.msk [vmem:[#allocation2 + $0x11] ss:$8 sm:$0x3] %vm589_vm0, %v1568_v1  ;;  %v1207_v10 = vpack.c.bf16 %v376_v8, %v374_v7  ;;  %1204 = vmatprep.subr.bf16.mxu0 %v1203_v5  ;;  %v1209_v15 = vpack.c.bf16 %v375_v12, %v373_v11 }
  0x6e   : > { %v378_v13 = vld [vmem:[#allocation6 + $0x48] sm:$0xff]  ;;  %v380_v14 = vld [vmem:[#allocation6 + $0x58] sm:$0xff]  ;;  %1206 = vmatpush1.bf16.msra.mxu0 %v1205_v9  ;;  %v377_v17 = vld [vmem:[#allocation6 + $0x40] sm:$0xff]  ;;  %s1088_s13 = sshll.u32 %s365_s11, 2  ;;  %s1094_s10 = sshll.u32 %s1636_s9, 7 }
  0x6f   : > { %1208 = vmatprep.subr.bf16.mxu0 %v1207_v10  ;;  %v1211_v16 = vpack.c.bf16 %v380_v14, %v378_v13  ;;  %v379_v18 = vld [vmem:[#allocation6 + $0x50] sm:$0xff]  ;;  %v382_v19 = vld [vmem:[#allocation6 + $0x68] sm:$0xff]  ;;  %v384_v20 = vld [vmem:[#allocation6 + $0x78] sm:$0xff]  ;;  %s367_s19 = scalar_lea.vmem %s1872_s0, %s1088_s13  ;;  %s1828_s25 = scalar_lea.hbm %s1880_s8, %s1094_s10 }
  0x70   : > { %v1213_v21 = vpack.c.bf16 %v379_v18, %v377_v17  ;;  %v1215_v22 = vpack.c.bf16 %v384_v20, %v382_v19  ;;  %v381_v23 = vld [vmem:[#allocation6 + $0x60] sm:$0xff]  ;;  %v383_v24 = vld [vmem:[#allocation6 + $0x70] sm:$0xff]  ;;  %v386_v25 = vld [vmem:[#allocation6 + $0x88] sm:$0xff]  ;;  %s961_s15 = scalar_lea.sflag [#allocation5], %s1784_s22  ;;  %p1894_p1 = scmp.ne.s32.totalorder %s1889_s24, 0 }
  0x71   : > { %v388_v26 = vld [vmem:[#allocation6 + $0x98] sm:$0xff]  ;;  %v1217_v27 = vpack.c.bf16 %v383_v24, %v381_v23  ;;  %v385_v29 = vld [vmem:[#allocation6 + $0x80] sm:$0xff]  ;;  %v387_v30 = vld [vmem:[#allocation6 + $0x90] sm:$0xff]  ;;  %s1569_s9 = smov [#allocation9]  }
  0x72   : > { %1210 = vmatpush1.bf16.msra.mxu0 %v1209_v15  ;;  %v1219_v28 = vpack.c.bf16 %v388_v26, %v386_v25  ;;  %v390_v31 = vld [vmem:[#allocation6 + $0xa8] sm:$0xff]  ;;  %v392_v32 = vld [vmem:[#allocation6 + $0xb8] sm:$0xff]  ;;  %v1221_v33 = vpack.c.bf16 %v387_v30, %v385_v29  ;;  %v389_v35 = vld [vmem:[#allocation6 + $0xa0] sm:$0xff]  ;;  %s1493_s14 = sshll.u32 %s1569_s9, 4  ;;  %s1494_s14 = int_to_ptr.vmem [resolvable:$false] %s1493_s14 }
  0x73   : > { %1212 = vmatprep.subr.bf16.mxu0 %v1211_v16  ;;  %v1223_v34 = vpack.c.bf16 %v392_v32, %v390_v31  ;;  %v391_v36 = vld [vmem:[#allocation6 + $0xb0] sm:$0xff]  ;;  %v394_v37 = vld [vmem:[#allocation6 + $0xc8] sm:$0xff]  ;;  %v396_v38 = vld [vmem:[#allocation6 + $0xd8] sm:$0xff] }
  0x74   : > { %v1225_v39 = vpack.c.bf16 %v391_v36, %v389_v35  ;;  %v1227_v40 = vpack.c.bf16 %v396_v38, %v394_v37  ;;  %v393_v41 = vld [vmem:[#allocation6 + $0xc0] sm:$0xff]  ;;  %v395_v42 = vld [vmem:[#allocation6 + $0xd0] sm:$0xff]  ;;  %v398_v43 = vld [vmem:[#allocation6 + $0xe8] sm:$0xff] }
  0x75   : > { %v400_v44 = vld [vmem:[#allocation6 + $0xf8] sm:$0xff]  ;;  %v1229_v45 = vpack.c.bf16 %v395_v42, %v393_v41  ;;  %v397_v47 = vld [vmem:[#allocation6 + $0xe0] sm:$0xff]  ;;  %v399_v48 = vld [vmem:[#allocation6 + $0xf0] sm:$0xff] }
  0x76   : > { %1214 = vmatpush1.bf16.msra.mxu0 %v1213_v21  ;;  %v1231_v46 = vpack.c.bf16 %v400_v44, %v398_v43  ;;  %v1233_v49 = vpack.c.bf16 %v399_v48, %v397_v47  ;;  %v368_v50 = vld [vmem:[%s367_s19] sm:$0xf]  ;;  %v625_v52 = vld [vmem:[#allocation8 + $0x88] sm:$0xff]  ;;  %v626_v57 = vld [vmem:[#allocation8 + $0x90] sm:$0xff] }
  0x77   : > { %1216 = vmatprep.subr.bf16.mxu0 %v1215_v22  ;;  %v624_v51 = vld [vmem:[#allocation8 + $0x80] sm:$0xff]  ;;  %v609_v55 = vld [vmem:[#allocation8 + $0x8] sm:$0xff]  ;;  %v627_v58 = vld [vmem:[#allocation8 + $0x98] sm:$0xff] }
  0x78   : > { %v608_v53 = vld [vmem:[#allocation8] sm:$0xff]  ;;  %v1267_v54 = vpack.c.bf16 %v625_v52, %v624_v51  ;;  %v610_v59 = vld [vmem:[#allocation8 + $0x10] sm:$0xff]  ;;  %v611_v60 = vld [vmem:[#allocation8 + $0x18] sm:$0xff]  ;;  %v1271_v61 = vpack.c.bf16 %v627_v58, %v626_v57 }
  0x79   : > { %v1269_v56 = vpack.c.bf16 %v609_v55, %v608_v53  ;;  %v1273_v62 = vpack.c.bf16 %v611_v60, %v610_v59  ;;  %v628_v63 = vld [vmem:[#allocation8 + $0xa0] sm:$0xff]  ;;  %v629_v1 = vld [vmem:[#allocation8 + $0xa8] sm:$0xff]  ;;  %v663_v10 = vld [vmem:[#allocation8 + $0x190] sm:$0xff] }
  0x7a   : > { %1218 = vmatpush1.bf16.msra.mxu0 %v1217_v27  ;;  %v1275_v2 = vpack.c.bf16 %v629_v1, %v628_v63  ;;  %v612_v3 = vld [vmem:[#allocation8 + $0x20] sm:$0xff]  ;;  %v613_v4 = vld [vmem:[#allocation8 + $0x28] sm:$0xff]  ;;  %v664_v11 = vld [vmem:[#allocation8 + $0x198] sm:$0xff] }
  0x7b   : > { %1220 = vmatprep.subr.bf16.mxu0 %v1219_v28  ;;  %v1277_v5 = vpack.c.bf16 %v613_v4, %v612_v3  ;;  %v661_v6 = vld [vmem:[#allocation8 + $0x180] sm:$0xff]  ;;  %v662_v7 = vld [vmem:[#allocation8 + $0x188] sm:$0xff]  ;;  %v1239_v17 = vpack.c.bf16 %v664_v11, %v663_v10  ;;  %v647_v18 = vld [vmem:[#allocation8 + $0x110] sm:$0xff] }
  0x7c   : > { %v645_v8 = vld [vmem:[#allocation8 + $0x100] sm:$0xff]  ;;  %v646_v9 = vld [vmem:[#allocation8 + $0x108] sm:$0xff]  ;;  %v1235_v13 = vpack.c.bf16 %v662_v7, %v661_v6  ;;  %v648_v19 = vld [vmem:[#allocation8 + $0x118] sm:$0xff] }
  0x7d   : > { %v472_v15 = vld [vmem:[%s1874_s2] sm:$0xff]  ;;  %v1237_v16 = vpack.c.bf16 %v646_v9, %v645_v8  ;;  %v666_v21 = vld [vmem:[#allocation8 + $0x1a8] sm:$0xff]  ;;  %v1241_v22 = vpack.c.bf16 %v648_v19, %v647_v18  ;;  %v630_v27 = vld [vmem:[#allocation8 + $0xb0] sm:$0xff] }
  0x7e   : > { %1222 = vmatpush1.bf16.msra.mxu0 %v1221_v33  ;;  %v665_v20 = vld [vmem:[#allocation8 + $0x1a0] sm:$0xff]  ;;  %v650_v25 = vld [vmem:[#allocation8 + $0x128] sm:$0xff]  ;;  %v631_v28 = vld [vmem:[#allocation8 + $0xb8] sm:$0xff] }
  0x7f   : > { %1224 = vmatprep.subr.bf16.mxu0 %v1223_v34  ;;  %v1243_v23 = vpack.c.bf16 %v666_v21, %v665_v20  ;;  %v649_v24 = vld [vmem:[#allocation8 + $0x120] sm:$0xff]  ;;  %v1279_v29 = vpack.c.bf16 %v631_v28, %v630_v27  ;;  %v614_v30 = vld [vmem:[#allocation8 + $0x30] sm:$0xff]  ;;  %v615_v31 = vld [vmem:[#allocation8 + $0x38] sm:$0xff]  ;;  %v560_v27 = vshrl.u32 %v559_v0, 7 }
  0x80   : > { %v1245_v26 = vpack.c.bf16 %v650_v25, %v649_v24  ;;  %v1281_v32 = vpack.c.bf16 %v615_v31, %v614_v30  ;;  %v667_v33 = vld [vmem:[#allocation8 + $0x1b0] sm:$0xff]  ;;  %v668_v34 = vld [vmem:[#allocation8 + $0x1b8] sm:$0xff]  ;;  %v616_v42 = vld [vmem:[#allocation8 + $0x40] sm:$0xff] }
  0x81   : > { %v1247_v35 = vpack.c.bf16 %v668_v34, %v667_v33  ;;  %v651_v36 = vld [vmem:[#allocation8 + $0x130] sm:$0xff]  ;;  %v652_v37 = vld [vmem:[#allocation8 + $0x138] sm:$0xff]  ;;  %v617_v43 = vld [vmem:[#allocation8 + $0x48] sm:$0xff]  ;;  %v561_v28 = vsub.s32 0, %v560_v27  ;;  %v565_v30 = vsub.s32 1, %v560_v27 }
  0x82   : > { %1226 = vmatpush1.bf16.msra.mxu0 %v1225_v39  ;;  %v1249_v38 = vpack.c.bf16 %v652_v37, %v651_v36  ;;  %v632_v39 = vld [vmem:[#allocation8 + $0xc0] sm:$0xff]  ;;  %v1285_v44 = vpack.c.bf16 %v617_v43, %v616_v42  ;;  %v634_v51 = vld [vmem:[#allocation8 + $0xd0] sm:$0xff]  ;;  %v635_v52 = vld [vmem:[#allocation8 + $0xd8] sm:$0xff] }
  0x83   : > { %1228 = vmatprep.subr.bf16.mxu0 %v1227_v40  ;;  %v633_v40 = vld [vmem:[#allocation8 + $0xc8] sm:$0xff]  ;;  %v653_v48 = vld [vmem:[#allocation8 + $0x140] sm:$0xff]  ;;  %v1287_v53 = vpack.c.bf16 %v635_v52, %v634_v51  ;;  %v619_v55 = vld [vmem:[#allocation8 + $0x58] sm:$0xff] }
  0x84   : > { %v1283_v41 = vpack.c.bf16 %v633_v40, %v632_v39  ;;  %v671_v57 = vld [vmem:[#allocation8 + $0x1d0] sm:$0xff]  ;;  %v672_v58 = vld [vmem:[#allocation8 + $0x1d8] sm:$0xff]  ;;  %v636_v63 = vld [vmem:[#allocation8 + $0xe0] sm:$0xff] }
  0x85   : > { %v1255_v59 = vpack.c.bf16 %v672_v58, %v671_v57  ;;  %v655_v60 = vld [vmem:[#allocation8 + $0x150] sm:$0xff]  ;;  %v637_v1 = vld [vmem:[#allocation8 + $0xe8] sm:$0xff]  ;;  %v620_v3 = vld [vmem:[#allocation8 + $0x60] sm:$0xff] }
  0x86   : > { %1230 = vmatpush1.bf16.msra.mxu0 %v1229_v45  ;;  %v669_v45 = vld [vmem:[#allocation8 + $0x1c0] sm:$0xff]  ;;  %v621_v4 = vld [vmem:[#allocation8 + $0x68] sm:$0xff]  ;;  %v638_v11 = vld [vmem:[#allocation8 + $0xf0] sm:$0xff] }
  0x87   : > { %1232 = vmatprep.subr.bf16.mxu0 %v1231_v46  ;;  %v670_v46 = vld [vmem:[#allocation8 + $0x1c8] sm:$0xff]  ;;  %v673_v6 = vld [vmem:[#allocation8 + $0x1e0] sm:$0xff]  ;;  %v676_v19 = vld [vmem:[#allocation8 + $0x1f8] sm:$0xff] }
  0x88   : > { %v1251_v47 = vpack.c.bf16 %v670_v46, %v669_v45  ;;  %v674_v7 = vld [vmem:[#allocation8 + $0x1e8] sm:$0xff]  ;;  %v657_v8 = vld [vmem:[#allocation8 + $0x160] sm:$0xff]  ;;  %v659_v20 = vld [vmem:[#allocation8 + $0x170] sm:$0xff] }
  0x89   : > { %v1259_v9 = vpack.c.bf16 %v674_v7, %v673_v6  ;;  %v658_v10 = vld [vmem:[#allocation8 + $0x168] sm:$0xff]  ;;  %v660_v21 = vld [vmem:[#allocation8 + $0x178] sm:$0xff]  ;;  %v851_v24 = vld [vmem:[#allocation8 + $0x280] sm:$0xff] }
  0x8a   : > { %1234 = vmatpush1.bf16.msra.mxu0 %v1233_v49  ;;  %v654_v49 = vld [vmem:[#allocation8 + $0x148] sm:$0xff]  ;;  %v473_v31 = vld [vmem:[%s1788_s16] sm:$0xff] }
  0x8b   : > { %1268 = vmatprep.subr.bf16.mxu0 %v1267_v54  ;;  %v618_v54 = vld [vmem:[#allocation8 + $0x50] sm:$0xff]  ;;  %v852_v25 = vld [vmem:[#allocation8 + $0x288] sm:$0xff]  ;;  %v843_v27 = vld [vmem:[#allocation8 + $0x240] sm:$0xff] }
  0x8c   : > { %v474_v34 = vld [vmem:[%s1788_s16 + $0x8] sm:$0xff]  ;;  %v853_v51 = vld [vmem:[#allocation8 + $0x290] sm:$0xff]  ;;  %s1087_s16 = sshll.u32 %s1784_s22, 3 }
  0x8d   : > { %466 = vmatmul.mubr.f32.vlgmr.msra.gmra.mrb[0].mxu0 %v368_v50  ;;  %v1253_v50 = vpack.c.bf16 %v654_v49, %v653_v48  ;;  %v835_v49 = vld [vmem:[#allocation8 + $0x200] sm:$0xff]  ;;  %v837_v7 = vld [vmem:[#allocation8 + $0x210] sm:$0xff]  ;;  %s363_s17 = scalar_lea.vmem [#allocation9], %s1087_s16  ;;  %s1495_s16 = scalar_lea.vmem %s1494_s14, 256 }
  0x8e   : > { %1270 = vmatpush3.bf16.msra.mxu0 %v1269_v56  ;;  %v1289_v56 = vpack.c.bf16 %v619_v55, %v618_v54  ;;  %v854_v54 = vld [vmem:[#allocation8 + $0x298] sm:$0xff]  ;;  %s974_s19 = sshll.u32 %s363_s17, 4  ;;  %s1830_s19 = int_to_ptr.vmem [resolvable:$true] %s974_s19 }
  0x8f   : > { %1272 = vmatprep.subr.bf16.mxu0 %v1271_v61  ;;  %v656_v61 = vld [vmem:[#allocation8 + $0x158] sm:$0xff]  ;;  %v1303_v6 = vpack.c.bf16 %v854_v54, %v853_v51  ;;  %s1489_s26 = scalar_lea.vmem %s1830_s19, 128  ;;  %p1496_p9 = scmp.lt.s32.totalorder %s1830_s19, %s1494_s14 }
  0x90   : > { %p1490_p0 = scmp.ne.s32.totalorder %s1830_s19, %s1489_s26  ;;  %p1497_p12 = scmp.lt.s32.totalorder %s1495_s16, %s1489_s26 }
  0x92   : > { %1274 = vmatpush3.bf16.msra.mxu0 %v1273_v62  ;;  %v1257_v62 = vpack.c.bf16 %v656_v61, %v655_v60  ;;  %p1491_p3 = pnand %p1490_p0, %p1894_p1  ;;  %p1498_p2 = por %p1497_p12, %p1496_p9 }
  0x93   : > { %1276 = vmatprep.subr.bf16.mxu0 %v1275_v2  ;;  %v1291_v2 = vpack.c.bf16 %v637_v1, %v636_v63 }
  0x94   : > { %p1492_p5 = pneg %p1491_p3 }
  0x96   : > { %1278 = vmatpush3.bf16.msra.mxu0 %v1277_v5  ;;  %v1293_v5 = vpack.c.bf16 %v621_v4, %v620_v3  ;;  %p1499_p13 = pnand %p1498_p2, %p1492_p5 }
  0x97   : > { %1280 = vmatprep.subr.bf16.mxu0 %v1279_v29  ;;  %v557_v29 = vld [vmem:[%s1876_s4] sm:$0x3] }
  0x98   : > { %v562_v33 = vrot.slane %v557_v29, %v561_v28  ;;  %v566_v36 = vrot.slane %v557_v29, %v565_v30  ;;  %v861_v29 = vld [vmem:[#allocation8 + $0x2d0] sm:$0xff] }
  0x9a   : > { %1282 = vmatpush3.bf16.msra.mxu0 %v1281_v32  ;;  %v571_v32 = vld [vmem:[%s1877_s5] sm:$0x3] }
  0x9b   : > { %1284 = vmatprep.subr.bf16.mxu0 %v1283_v41  ;;  %v580_v0 = vrot.slane %v571_v32, %v565_v30  ;;  %v862_v30 = vld [vmem:[#allocation8 + $0x2d8] sm:$0xff] }
  0x9e   : > { %1286 = vmatpush3.bf16.msra.mxu0 %v1285_v44 }
  0x9f   : > { %1288 = vmatprep.subr.bf16.mxu0 %v1287_v53 }
  0xa2   : > { %1290 = vmatpush3.bf16.msra.mxu0 %v1289_v56 }
  0xa3   : > { %1292 = vmatprep.subr.bf16.mxu0 %v1291_v2 }
  0xa6   : > { %1294 = vmatpush3.bf16.msra.mxu0 %v1293_v5 }
 0x160   : > { %v467_v12 = vpop.f32.mrb[0].mxu0 }
 0x161   : > { %v469_v14 = vpop.f32.mrb[1].mxu0 }
 0x162   : > { %1089 = vmatprep.subr.msk.mxu1 %vm479_vm1, %v469_v14 }
 0x163   : > { %1090 = vmatpush1.msk.msra.mxu1 %vm479_vm1, %v467_v12  ;;  %v639_v12 = vld [vmem:[#allocation8 + $0xf8] sm:$0xff] }
 0x164   : > { %1091 = vmatmul.mubr.msk.f32.vlgmr.msra.gmra.mrb[0].mxu1 %vm475_vm2, %v472_v15  ;;  %1236 = vmatprep.subr.bf16.mxu1 %v1235_v13  ;;  %v1261_v13 = vpack.c.bf16 %v658_v10, %v657_v8  ;;  %v1295_v14 = vpack.c.bf16 %v639_v12, %v638_v11  ;;  %v622_v15 = vld [vmem:[#allocation8 + $0x70] sm:$0xff]  ;;  %v838_v8 = vld [vmem:[#allocation8 + $0x218] sm:$0xff]  ;;  %v855_v10 = vld [vmem:[#allocation8 + $0x2a0] sm:$0xff] }
 0x165   : > { %1238 = vmatpush3.bf16.msra.mxu1 %v1237_v16  ;;  %v623_v16 = vld [vmem:[#allocation8 + $0x78] sm:$0xff]  ;;  %v856_v11 = vld [vmem:[#allocation8 + $0x2a8] sm:$0xff] }
 0x166   : > { %1240 = vmatprep.subr.bf16.mxu1 %v1239_v17  ;;  %v675_v17 = vld [vmem:[#allocation8 + $0x1f0] sm:$0xff]  ;;  %v1297_v18 = vpack.c.bf16 %v623_v16, %v622_v15  ;;  %1296 = vmatprep.subr.bf16.mxu0 %v1295_v14  ;;  %v1307_v14 = vpack.c.bf16 %v856_v11, %v855_v10  ;;  %v839_v15 = vld [vmem:[#allocation8 + $0x220] sm:$0xff]  ;;  %v840_v16 = vld [vmem:[#allocation8 + $0x228] sm:$0xff] }
 0x168   : > { %1298 = vmatpush3.bf16.msra.mxu0 %v1297_v18  ;;  %v858_v18 = vld [vmem:[#allocation8 + $0x2b8] sm:$0xff] }
 0x169   : > { %1242 = vmatpush3.bf16.msra.mxu1 %v1241_v22  ;;  %v1263_v22 = vpack.c.bf16 %v676_v19, %v675_v17  ;;  %v857_v17 = vld [vmem:[#allocation8 + $0x2b0] sm:$0xff]  ;;  %v1309_v19 = vpack.c.bf16 %v840_v16, %v839_v15 }
 0x16a   : > { %1244 = vmatprep.subr.bf16.mxu1 %v1243_v23  ;;  %v1265_v23 = vpack.c.bf16 %v660_v21, %v659_v20  ;;  %v1311_v20 = vpack.c.bf16 %v858_v18, %v857_v17  ;;  %v841_v21 = vld [vmem:[#allocation8 + $0x230] sm:$0xff] }
 0x16d   : > { %1246 = vmatpush3.bf16.msra.mxu1 %v1245_v26  ;;  %v1299_v26 = vpack.c.bf16 %v852_v25, %v851_v24  ;;  %v860_v24 = vld [vmem:[#allocation8 + $0x2c8] sm:$0xff] }
 0x16e   : > { %1248 = vmatprep.subr.bf16.mxu1 %v1247_v35 }
 0x171   : > { %1250 = vmatpush3.bf16.msra.mxu1 %v1249_v38  ;;  %v576_v38 = vrot.slane %v571_v32, %v561_v28  ;;  %v844_v28 = vld [vmem:[#allocation8 + $0x248] sm:$0xff]  ;;  %v1319_v32 = vpack.c.bf16 %v862_v30, %v861_v29 }
 0x172   : > { %1252 = vmatprep.subr.bf16.mxu1 %v1251_v47 }
 0x175   : > { %1254 = vmatpush3.bf16.msra.mxu1 %v1253_v50  ;;  %v836_v50 = vld [vmem:[#allocation8 + $0x208] sm:$0xff] }
 0x176   : > { %1256 = vmatprep.subr.bf16.mxu1 %v1255_v59  ;;  %v1301_v1 = vpack.c.bf16 %v836_v50, %v835_v49 }
 0x179   : > { %1258 = vmatpush3.bf16.msra.mxu1 %v1257_v62 }
 0x17a   : > { %1260 = vmatprep.subr.bf16.mxu1 %v1259_v9 }
 0x17d   : > { %1262 = vmatpush3.bf16.msra.mxu1 %v1261_v13  ;;  %v1305_v13 = vpack.c.bf16 %v838_v8, %v837_v7 }
 0x17e   : > { %1264 = vmatprep.subr.bf16.mxu1 %v1263_v22  ;;  %v842_v22 = vld [vmem:[#allocation8 + $0x238] sm:$0xff] }
 0x17f   : > { %v1313_v25 = vpack.c.bf16 %v842_v22, %v841_v21 }
 0x181   : > { %1266 = vmatpush3.bf16.msra.mxu1 %v1265_v23  ;;  %v859_v23 = vld [vmem:[#allocation8 + $0x2c0] sm:$0xff] }
 0x182   : > { %1300 = vmatprep.subr.bf16.mxu1 %v1299_v26  ;;  %v1315_v26 = vpack.c.bf16 %v860_v24, %v859_v23 }
 0x237   : > { %v552_v35 = vpop.f32.mrb[0].mxu1 }
 0x238   : > { %v553_v37 = vadd.f32 %v552_v35, %v473_v31  ;;  %v554_v39 = vpop.f32.mrb[1].mxu1  ;;  %v1317_v31 = vpack.c.bf16 %v844_v28, %v843_v27  ;;  %v863_v35 = vld [vmem:[#allocation8 + $0x2e0] sm:$0xff] }
 0x239   : > { %v555_v40 = vadd.f32 %v554_v39, %v474_v34  ;;  %v846_v34 = vld [vmem:[#allocation8 + $0x258] sm:$0xff]  ;;  %v847_v39 = vld [vmem:[#allocation8 + $0x260] sm:$0xff] }
 0x23a   : > { %v569_v41 = vmul.f32 %v562_v33, %v553_v37  ;;  %v845_v33 = vld [vmem:[#allocation8 + $0x250] sm:$0xff] }
 0x23b   : > { %v570_v42 = vmul.f32 %v566_v36, %v555_v40  ;;  %v864_v36 = vld [vmem:[#allocation8 + $0x2e8] sm:$0xff]  ;;  %v1321_v37 = vpack.c.bf16 %v846_v34, %v845_v33 }
 0x23c   : > { %v583_v43 = vadd.f32 %v576_v38, %v569_v41  ;;  %v1323_v38 = vpack.c.bf16 %v864_v36, %v863_v35  ;;  %v848_v40 = vld [vmem:[#allocation8 + $0x268] sm:$0xff]  ;;  %v866_v41 = vld [vmem:[#allocation8 + $0x2f8] sm:$0xff] }
 0x23d   : > { %v584_v44 = vadd.f32 %v580_v0, %v570_v42  ;;  %v865_v0 = vld [vmem:[#allocation8 + $0x2f0] sm:$0xff]  ;;  %v1325_v42 = vpack.c.bf16 %v848_v40, %v847_v39 }
 0x23e   : > { %v585_v45 = vmax.f32 %v583_v43, 0.0  ;;  %v1327_v43 = vpack.c.bf16 %v866_v41, %v865_v0 }
 0x23f   : > { %v586_v46 = vmax.f32 %v584_v44, 0.0  ;;  %v849_v44 = vld [vmem:[#allocation8 + $0x270] sm:$0xff] }
 0x240   : > { %v598_v47 = vrot.slane %v585_v45, 7  ;;  %v850_v45 = vld [vmem:[#allocation8 + $0x278] sm:$0xff] }
 0x241   : > { %v599_v48 = vrot.slane %v586_v46, 7 }
 0x242   : > { %602 = vst [vmem:[#allocation2] sm:$0xfe] %v598_v47  ;;  %604 = vst [vmem:[#allocation2 + $0x10] sm:$0x1] %v598_v47 }
 0x243   : > { %603 = vst [vmem:[#allocation2 + $0x8] sm:$0xfe] %v599_v48  ;;  %605 = vst [vmem:[#allocation2 + $0x18] sm:$0x1] %v599_v48  ;;  %v1329_v48 = vpack.c.bf16 %v850_v45, %v849_v44 }
 0x249   : > { %v640_v52 = vld [vmem:[#allocation2] sm:$0xfe]  ;;  %v642_v53 = vld [vmem:[#allocation2 + $0x10] sm:$0x1] }
 0x24a   : > { %v607_v55 = vld [vmem:[#allocation2 + $0x8] sm:$0xff]  ;;  %v643_v57 = vld [vmem:[#allocation2 + $0x18] sm:$0x1]  ;;  %v682_v58 = vrot.slane %v640_v52, 1  ;;  %v606_v59 = vld [vmem:[#allocation2] sm:$0xff]  ;;  %v683_v62 = vrot.slane %v642_v53, 1 }
 0x24b   : > { %v641_v56 = vld [vmem:[#allocation2 + $0x8] sm:$0xfe]  ;;  %824 = vmatprep.mubr.f32.mxu0 %v607_v55  ;;  %v686_v61 = vrot.slane %v643_v57, 1  ;;  %v833_v2 = vld [vmem:[#allocation2 + $0x18] sm:$0x3] }
 0x24c   : > { %v685_v60 = vrot.slane %v641_v56, 1  ;;  %v831_v63 = vld [vmem:[#allocation2 + $0x8] sm:$0xfc]  ;;  %825 = vmatmul.mubr.f32.vlgmr.msra.gmra.mrb[2].mxu0 %v606_v59  ;;  %v876_v5 = vrot.slane %v833_v2, 2  ;;  %v684_v9 = vsel %vm681_vm3, %v682_v58, %v683_v62  ;;  %v830_v46 = vld [vmem:[#allocation2] sm:$0xfc] }
 0x24d   : > { %v875_v3 = vrot.slane %v831_v63, 2  ;;  %v832_v47 = vld [vmem:[#allocation2 + $0x10] sm:$0x3]  ;;  %v872_v49 = vrot.slane %v830_v46, 2  ;;  %v1092_v62 = vld [vmem:[%s1879_s7] ss:$0 sm:$0xff] }
 0x24e   : > { %v687_v4 = vsel %vm681_vm3, %v685_v60, %v686_v61  ;;  %v873_v50 = vrot.slane %v832_v47, 2 }
 0x24f   : > { %754 = vmatprep.mubr.f32.mxu1 %v687_v4  ;;  %v877_v12 = vsel %vm871_vm4, %v875_v3, %v876_v5 }
 0x250   : > { %755 = vmatmul.mubr.f32.vlgmr.msra.gmra.mrb[2].mxu1 %v684_v9  ;;  %v874_v51 = vsel %vm871_vm4, %v872_v49, %v873_v50 }
 0x251   : > { %1302 = vmatpush3.bf16.msra.mxu1 %v1301_v1  ;;  %944 = vmatprep.mubr.f32.mxu1 %v877_v12 }
 0x252   : > { %1304 = vmatprep.subr.bf16.mxu1 %v1303_v6 }
 0x255   : > { %1306 = vmatpush3.bf16.msra.mxu1 %v1305_v13 }
 0x256   : > { %1308 = vmatprep.subr.bf16.mxu1 %v1307_v14 }
 0x259   : > { %1310 = vmatpush3.bf16.msra.mxu1 %v1309_v19 }
 0x25a   : > { %1312 = vmatprep.subr.bf16.mxu1 %v1311_v20 }
 0x25d   : > { %1314 = vmatpush3.bf16.msra.mxu1 %v1313_v25 }
 0x25e   : > { %1316 = vmatprep.subr.bf16.mxu1 %v1315_v26 }
 0x261   : > { %1318 = vmatpush3.bf16.msra.mxu1 %v1317_v31 }
 0x262   : > { %1320 = vmatprep.subr.bf16.mxu1 %v1319_v32 }
 0x265   : > { %1322 = vmatpush3.bf16.msra.mxu1 %v1321_v37 }
 0x266   : > { %1324 = vmatprep.subr.bf16.mxu1 %v1323_v38 }
 0x269   : > { %1326 = vmatpush3.bf16.msra.mxu1 %v1325_v42 }
 0x26a   : > { %1328 = vmatprep.subr.bf16.mxu1 %v1327_v43 }
 0x26d   : > { %1330 = vmatpush3.bf16.msra.mxu1 %v1329_v48 }
 0x270   : > { %945 = vmatmul.mubr.f32.vlgmr.msra.gmra.mrb[4].mxu1 %v874_v51 }
 0x31f   : > { %v1165_v52 = vpop.f32.mrb[2].mxu0 }
 0x320   : > { %v1166_v53 = vpop.f32.mrb[3].mxu0 }
 0x321   : > { %v1167_v54 = vadd.f32 %v1166_v53, %v1165_v52 }
 0x323   : > { %v1130_v55 = vpop.f32.mrb[2].mxu1 }
 0x324   : > { %v1131_v56 = vpop.f32.mrb[3].mxu1 }
 0x325   : > { %v1132_v57 = vadd.f32 %v1131_v56, %v1130_v55 }
 0x327   : > { %v827_v58 = vadd.f32 %v1167_v54, %v1132_v57 }
 0x343   : > { %v1200_v59 = vpop.f32.mrb[4].mxu1 }
 0x344   : > { %v1201_v60 = vpop.f32.mrb[5].mxu1 }
 0x345   : > { %v1202_v61 = vadd.f32 %v1201_v60, %v1200_v59 }
 0x347   : > { %v950_v63 = vadd.f32 %v1202_v61, %v827_v58 }
 0x349   : > { %v958_v1 = vadd.f32 %v1092_v62, %v950_v63 }
 0x34b   : > { %959 = vst [vmem:[%s363_s17] sm:$0xff] %v958_v1 }
 0x34c   : > { %1502 = shalt.err (!%p1499_p13)
}
 0x34d   : > { %s1503_s22 = scalar_lea.hbm %s1828_s25, 128  ;;  %s1507_s10 = scalar_lea.hbm %s1880_s8, 256 }
 0x34e   : > { %p1504_p6 = scmp.ne.s32.totalorder %s1828_s25, %s1503_s22  ;;  %p1508_p7 = scmp.lt.u32.totalorder %s1828_s25, %s1880_s8 }
 0x34f   : > { %p1509_p8 = scmp.lt.u32.totalorder %s1507_s10, %s1503_s22  ;;  %p1511_p0 = scmp.lt.u32.totalorder %s1503_s22, %s1828_s25 }
 0x350   : > { %p1505_p10 = pnand %p1504_p6, %p1894_p1 }
 0x351   : > { %p1510_p11 = por %p1509_p8, %p1508_p7 }
 0x352   : > { %p1506_p4 = pneg %p1505_p10 }
 0x353   : > { %p1512_p3 = por %p1511_p0, %p1510_p11 }
 0x355   : > { %p1513_p5 = pnand %p1512_p3, %p1506_p4 }
 0x357   : > { %1516 = shalt.err (!%p1513_p5)
}
 0x358   : > { %1341 = dma.vmem_to_hbm [thread:$0]  (%p1894_p1), %s1830_s19, 128, %s1828_s25, %s961_s15  }
 0x359 PF: > { %s986_s18 = sand.u32 1, %s1547_s27   ;;  %p1895_p9 = scmp.ne.s32.totalorder %s1885_s12, 0 }
 0x35a   : > { %p1896_p12 = scmp.ge.s32.totalorder %s1559_s30, 2  ;;  %s987_s26 = scalar_lea.sflag [#allocation5], %s986_s18 }
 0x35c   : > { %p1355_p2 = pnand %p1896_p12, %p1895_p9 }
 0x35e   : > { %1542 = dma.done.wait (!%p1355_p2), %s987_s26, 128  }
 0x35f   : > { %1544 = vsyncadd (!%p1355_p2), %s987_s26, 4294967168  ;;  %p22_p13 = scmp.ge.s32.totalorder %s1725_s20, 4   ;;  %s1897_s27 = smov %s1551_s28 }
 0x360   : > { %s1898_s28 = smov %s1555_s29  ;;  %s1899_s29 = smov %s1734_s23 }
 0x361   : > { %s1900_s30 = smov %s1725_s20  ;;  %24 = sbr.rel (!%p22_p13) target bundleno = 6 (0x6), region = 111 }
 0x368   :  { %992 = vsyncpa [#allocation4], 1 }
 0x369   :  { %994 = vsyncpa [#allocation4 + $0x1], 1 }
 0x36a   :  { %995 = vsyncpa [#allocation7], 1 }
 0x36b   :  { %996 = vsyncpa [#allocation5], 1 }
 0x36c   :  { %998 = vsyncpa [#allocation5 + $0x1], 1 }

</bundles_post_ra>
